<compile_context>
chip_gen: v5e
topology: v5e:2x2
jax: 0.10.0
libtpu: 0.0.40
codegen_flags: <defaults>
</compile_context>

<pallas_src>
import math

import jax
import jax.numpy as jnp
from jax.experimental import pallas as pl
from jax.experimental.pallas import tpu as pltpu

_LANE_CANDIDATES = (1024, 512, 256, 128)   # multiples of 128, widest first
_FALLBACK_LANES = 512                      # used only on the (rare) pad path
_TARGET_BLOCK_BYTES = 2 * 1024 * 1024      # ~2 MiB per block


def _threshold_kernel(thr_ref, x_ref, o_ref):
    # thr_ref: (1, 1) f32 scalar in SMEM; x_ref/o_ref: (row_block, lanes) VMEM.
    t = thr_ref[0, 0]
    x = x_ref[...].astype(jnp.float32)
    o_ref[...] = jax.nn.sigmoid(x - t).astype(o_ref.dtype)


def _sublane_multiple(dtype):
    # Min second-minor tile: 8 rows for 32-bit, 16 for 16-bit, 32 for 8-bit.
    itemsize = jnp.dtype(dtype).itemsize
    return 8 * max(1, 4 // max(itemsize, 1))


def threshold_layer(x, threshold):
    """Elementwise sigmoid(x - threshold).  x: any shape, threshold: scalar."""
    orig_shape = x.shape
    dtype = x.dtype
    itemsize = jnp.dtype(dtype).itemsize
    n = math.prod(orig_shape)

    if n == 0:
        return jax.nn.sigmoid(x - jnp.asarray(threshold, dtype))

    # --- choose lane width; prefer divisors of n (no pad / no output slice) ---
    lanes = None
    needs_pad = False
    for cand in _LANE_CANDIDATES:
        if n % cand == 0:
            lanes = cand
            break
    if lanes is None:
        lanes = _FALLBACK_LANES
        needs_pad = True

    rows = -(-n // lanes)

    flat = x.reshape(-1)
    if needs_pad:
        flat = jnp.pad(flat, (0, rows * lanes - n))
    x2d = flat.reshape(rows, lanes)

    # --- row-block sizing (dtype-aware, >=2 blocks for v7x megacore when possible) ---
    sub = _sublane_multiple(dtype)
    max_row_block = max(sub, (_TARGET_BLOCK_BYTES // (lanes * itemsize)) // sub * sub)
    if rows < 2 * sub:
        # Tiny input: one full-extent block (block dims == array dims is legal).
        row_block = rows
    else:
        half = (rows // 2) // sub * sub          # aim for >=2 blocks
        row_block = max(sub, min(max_row_block, half))
    grid = (-(-rows // row_block),)              # ragged trailing block is masked by Pallas

    thr = jnp.asarray(threshold, dtype=jnp.float32).reshape(1, 1)

    cost = pl.CostEstimate(
        flops=2 * n,
        transcendentals=n,
        bytes_accessed=2 * n * itemsize,
    )

    out2d = pl.pallas_call(
        _threshold_kernel,
        out_shape=jax.ShapeDtypeStruct((rows, lanes), dtype),
        grid_spec=pltpu.PrefetchScalarGridSpec(
            num_scalar_prefetch=0,
            grid=grid,
            in_specs=[
                pl.BlockSpec(memory_space=pltpu.MemorySpace.SMEM),      # threshold scalar
                pl.BlockSpec((row_block, lanes), lambda i: (i, 0)),     # input block
            ],
            out_specs=pl.BlockSpec((row_block, lanes), lambda i: (i, 0)),
        ),
        compiler_params=pltpu.CompilerParams(
            dimension_semantics=("parallel",),
        ),
        cost_estimate=cost,
    )(thr, x2d)

    out = out2d.reshape(-1)
    if needs_pad:
        out = out[:n]
    return out.reshape(orig_shape)


if __name__ == "__main__":
    key = jax.random.PRNGKey(0)
    init_threshold = jnp.float32(3.0)   # nn.Parameter(torch.tensor(3.0))

    # Lane-aligned NCHW input (STA/LTA ratio map): exercises the zero-pad fast path.
    x = jax.random.uniform(key, (2, 4, 16, 16), dtype=jnp.float32) * 6.0
    out = jax.block_until_ready(threshold_layer(x, init_threshold))
    ref = jax.nn.sigmoid(x - init_threshold)
    assert out.shape == x.shape and out.dtype == x.dtype
    assert jnp.max(jnp.abs(out - ref)) < 1e-6

    # Non-lane-aligned shape: exercises the fallback pad/slice path.
    x_odd = jax.random.uniform(jax.random.PRNGKey(1), (2, 3, 13, 17),
                               dtype=jnp.float32) * 6.0
    out_odd = jax.block_until_ready(threshold_layer(x_odd, init_threshold))
    ref_odd = jax.nn.sigmoid(x_odd - init_threshold)
    assert out_odd.shape == x_odd.shape
    assert jnp.max(jnp.abs(out_odd - ref_odd)) < 1e-6

    print("KERNEL_OK")
</pallas_src>

<mosaic_0001>
module attributes {stable_mosaic.version = 11 : i64} {
  func.func @_threshold_kernel(%arg0: i32, %arg1: memref<1x1xf32, #tpu.memory_space<smem>>, %arg2: memref<2x1024xf32, #tpu.memory_space<vmem>>, %arg3: memref<2x1024xf32, #tpu.memory_space<vmem>>) attributes {dimension_semantics = [#tpu.dimension_semantics<parallel>], iteration_bounds = array<i64: 1>, scalar_prefetch = 0 : i64, scratch_operands = 0 : i64, tpu.core_type = #tpu.core_type<tc>, window_params = [{transform_indices = @transform_0, window_bounds = array<i64: 1, 1>}, {transform_indices = @transform_1, window_bounds = array<i64: 2, 1024>}, {transform_indices = @transform_2, window_bounds = array<i64: 2, 1024>}]} {
    %c0 = arith.constant 0 : index
    %c0_0 = arith.constant 0 : index
    %0 = memref.load %arg1[%c0, %c0_0] : memref<1x1xf32, #tpu.memory_space<smem>>
    %c0_1 = arith.constant 0 : index
    %c0_2 = arith.constant 0 : index
    %1 = vector.load %arg2[%c0_1, %c0_2] : memref<2x1024xf32, #tpu.memory_space<vmem>>, vector<2x1024xf32>
    %2 = vector.broadcast %0 : f32 to vector<2x1024xf32>
    %3 = arith.subf %1, %2 : vector<2x1024xf32>
    %4 = arith.negf %3 : vector<2x1024xf32>
    %5 = math.exp %4 : vector<2x1024xf32>
    %cst = arith.constant 1.000000e+00 : f32
    %6 = vector.broadcast %cst : f32 to vector<2x1024xf32>
    %7 = arith.addf %6, %5 : vector<2x1024xf32>
    %8 = arith.divf %6, %7 : vector<2x1024xf32>
    %c0_3 = arith.constant 0 : index
    %c0_4 = arith.constant 0 : index
    %9 = vector.load %arg3[%c0_3, %c0_4] : memref<2x1024xf32, #tpu.memory_space<vmem>>, vector<2x1024xf32>
    tpu.vector_store %arg3[%c0_3, %c0_4], %8 {strides = array<i32>} : memref<2x1024xf32, #tpu.memory_space<vmem>>, vector<2x1024xf32>,
    return
  }
  func.func @transform_0(%arg0: i32) -> (i32, i32) {
    %c0_i32 = arith.constant 0 : i32
    %c0_i32_0 = arith.constant 0 : i32
    %c0_i32_1 = arith.constant 0 : i32
    return %c0_i32, %c0_i32_0 : i32, i32
  }
  func.func @transform_1(%arg0: i32) -> (i32, i32) {
    %c0_i32 = arith.constant 0 : i32
    %c0_i32_0 = arith.constant 0 : i32
    return %arg0, %c0_i32 : i32, i32
  }
  func.func @transform_2(%arg0: i32) -> (i32, i32) {
    %c0_i32 = arith.constant 0 : i32
    %c0_i32_0 = arith.constant 0 : i32
    return %arg0, %c0_i32 : i32, i32
  }
}

</mosaic_0001>

<bundles_post_ra>
// kernel: tpu_custom_call.1
= control target key start
LH: loop header
LB: loop body
LE: loop exit
PB: predicated region body
PF: predicated region fallthrough
CT: control target
= control target key end

     0   :  { %8 = vsyncpa [#allocation4], 0  ;;  %s180_s0 = inlined_call_operand.<no memory space> [shape: f32[1,1], index: 0, kind: input, shape index: {}]   ;;  %s181_s1 = inlined_call_operand.hbm [shape: f32[2,1024], index: 1, kind: input, shape index: {}]   ;;  %s182_s2 = inlined_call_operand.hbm [shape: f32[2,1024], index: 2, kind: output, shape index: {}]  }
   0x1   :  { %9 = vsyncpa [#allocation5], 0  ;;  %s17_s11 = sshll.u32 %s181_s1, 4  ;;  %s154_s12 = smov [#allocation3]   ;;  %s18_s11 = int_to_ptr.hbm [resolvable:$true] %s17_s11 }
   0x2   :  { %s19_s13 = sshll.u32 %s154_s12, 4  ;;  %s20_s13 = int_to_ptr.vmem [resolvable:$true] %s19_s13 }
   0x3   :  { %22 = dma.hbm_to_vmem [thread:$0]  %s18_s11, 256, %s20_s13, [#allocation4]  }
   0x4   :  { %150 = dma.done.wait [#allocation4], 256  }
   0x5   :  { %151 = vsyncadd [#allocation4], 4294967040  ;;  %v30_v0 = vstv %s180_s0  ;;  %v28_v1 = vld [vmem:[#allocation3] sm:$0xff]  ;;  %v29_v2 = vld [vmem:[#allocation3 + $0x8] sm:$0xff]  ;;  %s155_s0 = smov [#allocation6]   ;;  %s80_s18 = sshll.u32 %s182_s2, 4  ;;  %s81_s18 = int_to_ptr.hbm [resolvable:$true] %s80_s18 }
   0x6   :  { %v31_v3 = vsub.f32 %v28_v1, %v30_v0  ;;  %v32_v4 = vsub.f32 %v29_v2, %v30_v0  ;;  %s78_s1 = sshll.u32 %s155_s0, 4  ;;  %s79_s1 = int_to_ptr.vmem [resolvable:$true] %s78_s1 }
   0x8   :  { %v90_v5 = vmul.f32 -1.442695, %v31_v3  ;;  %v91_v6 = vmul.f32 -1.442695, %v32_v4 }
   0xa   :  { %94 = vpow2.f32 %v90_v5 }
   0xb   :  { %96 = vpow2.f32 %v91_v6 }
  0x10   :  { %v95_v7 = vpop.eup %94 }
  0x11   :  { %v97_v8 = vpop.eup %96  ;;  %v39_v9 = vadd.f32 1.0, %v95_v7 }
  0x12   :  { %v40_v10 = vadd.f32 1.0, %v97_v8 }
  0x13   :  { %98 = vrcp.f32 %v39_v9  ;;  %vm46_vm0 = vweird.f32 %v39_v9  ;;  %v52_v14 = vand.u32 2147483648, %v39_v9  ;;  %v50_v17 = vand.u32 2147483647, %v39_v9 }
  0x14   :  { %100 = vrcp.f32 %v40_v10  ;;  %v67_v18 = vand.u32 2147483648, %v40_v10  ;;  %vm61_vm2 = vweird.f32 %v40_v10  ;;  %v65_v20 = vand.u32 2147483647, %v40_v10 }
  0x15   :  { %v53_v22 = vor.u32 1.1754944e-38, %v52_v14  ;;  %vm51_vm5 = vcmp.eq.f32.partialorder %v50_v17, 8.507059e+37 }
  0x16   :  { %v68_v25 = vor.u32 1.1754944e-38, %v67_v18  ;;  %vm66_vm7 = vcmp.eq.f32.partialorder %v65_v20, 8.507059e+37 }
  0x19   :  { %v99_v11 = vpop.eup %98 }
  0x1a   :  { %v101_v12 = vpop.eup %100  ;;  %v42_v13 = vmul.f32 %v99_v11, %v39_v9  ;;  %vm47_vm1 = vweird.f32 %v99_v11 }
  0x1b   :  { %v57_v15 = vmul.f32 %v101_v12, %v40_v10  ;;  %vm62_vm3 = vweird.f32 %v101_v12  ;;  %vm48_vm4 = vmor %vm46_vm0, %vm47_vm1 }
  0x1c   :  { %v43_v16 = vsub.f32 1.0, %v42_v13  ;;  %vm63_vm6 = vmor %vm61_vm2, %vm62_vm3 }
  0x1d   :  { %v58_v19 = vsub.f32 1.0, %v57_v15 }
  0x1e   :  { %v44_v21 = vmul.f32 %v99_v11, %v43_v16 }
  0x1f   :  { %v59_v23 = vmul.f32 %v101_v12, %v58_v19 }
  0x20   :  { %v45_v24 = vadd.f32 %v99_v11, %v44_v21 }
  0x21   :  { %v60_v26 = vadd.f32 %v101_v12, %v59_v23 }
  0x22   :  { %v49_v27 = vsel %vm48_vm4, %v99_v11, %v45_v24 }
  0x23   :  { %v54_v28 = vsel %vm51_vm5, %v53_v22, %v49_v27  ;;  %v64_v29 = vsel %vm63_vm6, %v101_v12, %v60_v26 }
  0x24   :  { %71 = vst [vmem:[#allocation6] sm:$0xff] %v54_v28  ;;  %v69_v30 = vsel %vm66_vm7, %v68_v25, %v64_v29 }
  0x25   :  { %72 = vst [vmem:[#allocation6 + $0x8] sm:$0xff] %v69_v30 }
  0x26   :  { %83 = dma.vmem_to_hbm [thread:$0]  %s79_s1, 256, %s81_s18, [#allocation5]  }
  0x27   :  { %152 = dma.done.wait [#allocation5], 256  }
  0x28   :  { %153 = vsyncadd [#allocation5], 4294967040 }
  0x29   :  { %88 = vsyncpa [#allocation4], 1 }
  0x2a   :  { %89 = vsyncpa [#allocation5], 1 }

</bundles_post_ra>
